<compile_context>
chip_gen: v7x
topology: tpu7x:2x2x1
jax: 0.10.0
libtpu: 0.0.40
codegen_flags: <defaults>
</compile_context>

<pallas_src>
import jax
import jax.numpy as jnp
from jax.experimental import pallas as pl
from jax.experimental.pallas import tpu as pltpu


def mlp_kernel(x_ref, w1_ref, b1_ref, w2_ref, b2_ref, o_ref):
    # dropout1 (p=0.25) / dropout2 (p=0.5) are identity in eval mode.
    w1 = w1_ref[...]
    w2 = w2_ref[...]
    x = x_ref[...].astype(w1.dtype)          # in-kernel cast (free if x is already bf16)
    # fc1 + relu (bf16 operands, f32 accumulation on the MXU)
    h = jnp.dot(x, w1, preferred_element_type=jnp.float32)
    h = jnp.maximum(h + b1_ref[...], 0.0)
    # fc2 + sigmoid
    z = jnp.dot(h.astype(w2.dtype), w2, preferred_element_type=jnp.float32)
    z = z + b2_ref[...]
    o_ref[...] = jax.nn.sigmoid(z).astype(o_ref.dtype)


def _round_up(n, m):
    return pl.cdiv(n, m) * m


def _block_diag_repeat(w, n):
    """(a, b) -> (n*a, n*b) with `w` repeated on the diagonal, zeros elsewhere."""
    return jnp.kron(jnp.eye(n, dtype=w.dtype), w)


def net_forward(x, w1, b1, w2, b2, *, tb=None, max_tb=4096,
                compute_dtype=jnp.bfloat16, out_dtype=jnp.bfloat16):
    """x: (B, D_in); w1: (D_in, D_h); b1: (D_h,)|(1,D_h); w2: (D_h, D_out); b2: (D_out,)|(1,D_out)."""
    B, D_in = x.shape
    D_h = w1.shape[1]
    D_out = w2.shape[1]
    b1 = b1.reshape(1, D_h)
    b2 = b2.reshape(1, D_out)

    # Row-fold factor so the output slab is a full 128 lanes (and the input
    # becomes lane-dense too).  pack=1 falls back to the plain layout.
    pack = 128 // D_out if (D_out < 128 and 128 % D_out == 0) else 1
    align = 8 * pack                     # output sublanes (tb/pack) must be %8

    # Tile selection: >=2 grid steps (v7x megacore has two TCs to feed), tile
    # capped at max_tb rows (VMEM headroom on v5e's 16 MiB scoped default),
    # and tb derived from the step count so padding waste stays small.
    if tb is None:
        steps = max(2, pl.cdiv(B, max_tb))
        tb = _round_up(pl.cdiv(B, steps), align)
    tb = max(align, _round_up(tb, align))

    # Pad ragged batch so the BlockSpec divides evenly; padded rows compute
    # sigmoid(bias terms) (harmless junk) and are sliced off below.
    B_pad = _round_up(B, tb)
    if B_pad != B:
        x = jnp.pad(x, ((0, B_pad - B), (0, 0)))

    if pack > 1:
        # Free row-major view: pack consecutive rows into the lane axis.
        x = x.reshape(B_pad // pack, pack * D_in)
        # Block-diagonal weight replication turns the row-fold back into a
        # single pair of lane-dense matmuls (zero blocks cost only idle MXU
        # flops -- the MXU has huge slack at these arithmetic intensities).
        w1 = _block_diag_repeat(w1, pack)          # (pack*D_in, pack*D_h)
        w2 = _block_diag_repeat(w2, pack)          # (pack*D_h, pack*D_out)
        b1 = jnp.tile(b1, (1, pack))
        b2 = jnp.tile(b2, (1, pack))

    # bf16 weights: half the weight bytes / cheaper MXU passes (f32 accumulate).
    w1 = w1.astype(compute_dtype)
    w2 = w2.astype(compute_dtype)

    rows = B_pad // pack
    tr = tb // pack
    di, dh, do = pack * D_in, pack * D_h, pack * D_out

    out = pl.pallas_call(
        mlp_kernel,
        out_shape=jax.ShapeDtypeStruct((rows, do), out_dtype),
        grid=(rows // tr,),
        in_specs=[
            # Streamed activations.  If profiling shows exposed input DMA,
            # add pipeline_mode=pl.Buffered(3) here rather than shrinking tb.
            pl.BlockSpec((tr, di), lambda i: (i, 0)),
            pl.BlockSpec((di, dh), lambda i: (0, 0)),   # VMEM-resident weights
            pl.BlockSpec((1, dh), lambda i: (0, 0)),
            pl.BlockSpec((dh, do), lambda i: (0, 0)),
            pl.BlockSpec((1, do), lambda i: (0, 0)),
        ],
        out_specs=pl.BlockSpec((tr, do), lambda i: (i, 0)),
        compiler_params=pltpu.CompilerParams(
            # Batch tiles are independent -> shard across TensorCores (v7x).
            dimension_semantics=("parallel",),
        ),
    )(x, w1, b1, w2, b2)

    out = out.reshape(B_pad, D_out)      # free metadata reshape: undo the row-fold
    return out[:B] if B_pad != B else out


if __name__ == "__main__":
    # sizes = [D_in, D_h, D_out] as in Net(sizes)
    sizes = (64, 128, 32)
    B = 200   # not a multiple of the tile -> exercises padding + a 2-step grid

    key = jax.random.PRNGKey(0)
    kx, kw1, kb1, kw2, kb2 = jax.random.split(key, 5)

    x = jax.random.normal(kx, (B, sizes[0]), dtype=jnp.float32)

    # PyTorch Linear init: U(-1/sqrt(fan_in), 1/sqrt(fan_in)); biases kept 1-D
    # like a straight PyTorch export to exercise the (D,) -> (1, D) handling.
    bound1 = 1.0 / float(sizes[0]) ** 0.5
    w1 = jax.random.uniform(kw1, (sizes[0], sizes[1]), jnp.float32, -bound1, bound1)
    b1 = jax.random.uniform(kb1, (sizes[1],), jnp.float32, -bound1, bound1)
    bound2 = 1.0 / float(sizes[1]) ** 0.5
    w2 = jax.random.uniform(kw2, (sizes[1], sizes[2]), jnp.float32, -bound2, bound2)
    b2 = jax.random.uniform(kb2, (sizes[2],), jnp.float32, -bound2, bound2)

    out = net_forward(x, w1, b1, w2, b2)
    out = jax.block_until_ready(out)
    assert out.shape == (B, sizes[2])
    assert out.dtype == jnp.bfloat16

    # Pure-f32 JAX reference (the true eval-mode PyTorch forward).  The kernel
    # uses bf16 weights and a bf16 output (documented inference choice), so
    # compare with a bf16-scale tolerance.
    h_ref = jnp.maximum(x @ w1 + b1, 0.0)
    ref = jax.nn.sigmoid(h_ref @ w2 + b2)
    err = float(jnp.max(jnp.abs(out.astype(jnp.float32) - ref)))
    assert err < 2e-2, f"mismatch vs reference: max abs err {err}"

    print("KERNEL_OK")
</pallas_src>

<mosaic_0001>
module attributes {stable_mosaic.version = 11 : i64} {
  func.func @mlp_kernel(%arg0: i32, %arg1: memref<32x256xf32, #tpu.memory_space<vmem>>, %arg2: memref<256x512xbf16, #tpu.memory_space<vmem>>, %arg3: memref<1x512xf32, #tpu.memory_space<vmem>>, %arg4: memref<512x128xbf16, #tpu.memory_space<vmem>>, %arg5: memref<1x128xf32, #tpu.memory_space<vmem>>, %arg6: memref<32x128xbf16, #tpu.memory_space<vmem>>) attributes {dimension_semantics = [#tpu.dimension_semantics<parallel>], iteration_bounds = array<i64: 2>, scalar_prefetch = 0 : i64, scratch_operands = 0 : i64, tpu.core_type = #tpu.core_type<tc>, window_params = [{transform_indices = @transform_0, window_bounds = array<i64: 32, 256>}, {pipeline_mode = #tpu.pipeline_mode<synchronous>, transform_indices = @transform_1, window_bounds = array<i64: 256, 512>}, {pipeline_mode = #tpu.pipeline_mode<synchronous>, transform_indices = @transform_2, window_bounds = array<i64: 1, 512>}, {pipeline_mode = #tpu.pipeline_mode<synchronous>, transform_indices = @transform_3, window_bounds = array<i64: 512, 128>}, {pipeline_mode = #tpu.pipeline_mode<synchronous>, transform_indices = @transform_4, window_bounds = array<i64: 1, 128>}, {transform_indices = @transform_5, window_bounds = array<i64: 32, 128>}]} {
    %c0 = arith.constant 0 : index
    %c0_0 = arith.constant 0 : index
    %0 = vector.load %arg2[%c0, %c0_0] : memref<256x512xbf16, #tpu.memory_space<vmem>>, vector<256x512xbf16>
    %c0_1 = arith.constant 0 : index
    %c0_2 = arith.constant 0 : index
    %1 = vector.load %arg4[%c0_1, %c0_2] : memref<512x128xbf16, #tpu.memory_space<vmem>>, vector<512x128xbf16>
    %c0_3 = arith.constant 0 : index
    %c0_4 = arith.constant 0 : index
    %2 = vector.load %arg1[%c0_3, %c0_4] : memref<32x256xf32, #tpu.memory_space<vmem>>, vector<32x256xf32>
    %3 = arith.truncf %2 : vector<32x256xf32> to vector<32x256xbf16>
    %cst = arith.constant dense<0.000000e+00> : vector<32x512xf32>
    %4 = tpu.matmul %3, %0, %cst {dimension_numbers = #tpu.dot_dimension_numbers<[1], [0], [0], [1], [0, 0, 1, 1], [], []>} : vector<32x256xbf16>, vector<256x512xbf16>, vector<32x512xf32> -> vector<32x512xf32>
    %c0_5 = arith.constant 0 : index
    %c0_6 = arith.constant 0 : index
    %5 = vector.load %arg3[%c0_5, %c0_6] : memref<1x512xf32, #tpu.memory_space<vmem>>, vector<1x512xf32>
    %6 = vector.broadcast %5 : vector<1x512xf32> to vector<32x512xf32>
    %7 = arith.addf %4, %6 : vector<32x512xf32>
    %cst_7 = arith.constant 0.000000e+00 : f32
    %8 = vector.broadcast %cst_7 : f32 to vector<32x512xf32>
    %9 = arith.maximumf %7, %8 : vector<32x512xf32>
    %10 = arith.truncf %9 : vector<32x512xf32> to vector<32x512xbf16>
    %cst_8 = arith.constant dense<0.000000e+00> : vector<32x128xf32>
    %11 = tpu.matmul %10, %1, %cst_8 {dimension_numbers = #tpu.dot_dimension_numbers<[1], [0], [0], [1], [0, 0, 1, 1], [], []>} : vector<32x512xbf16>, vector<512x128xbf16>, vector<32x128xf32> -> vector<32x128xf32>
    %c0_9 = arith.constant 0 : index
    %c0_10 = arith.constant 0 : index
    %12 = vector.load %arg5[%c0_9, %c0_10] : memref<1x128xf32, #tpu.memory_space<vmem>>, vector<1x128xf32>
    %13 = vector.broadcast %12 : vector<1x128xf32> to vector<32x128xf32>
    %14 = arith.addf %11, %13 : vector<32x128xf32>
    %15 = arith.negf %14 : vector<32x128xf32>
    %16 = math.exp %15 : vector<32x128xf32>
    %cst_11 = arith.constant 1.000000e+00 : f32
    %17 = vector.broadcast %cst_11 : f32 to vector<32x128xf32>
    %18 = arith.addf %17, %16 : vector<32x128xf32>
    %19 = arith.divf %17, %18 : vector<32x128xf32>
    %20 = arith.truncf %19 : vector<32x128xf32> to vector<32x128xbf16>
    %c0_12 = arith.constant 0 : index
    %c0_13 = arith.constant 0 : index
    %21 = vector.load %arg6[%c0_12, %c0_13] : memref<32x128xbf16, #tpu.memory_space<vmem>>, vector<32x128xbf16>
    tpu.vector_store %arg6[%c0_12, %c0_13], %20 {strides = array<i32>} : memref<32x128xbf16, #tpu.memory_space<vmem>>, vector<32x128xbf16>,
    return
  }
  func.func @transform_0(%arg0: i32) -> (i32, i32) {
    %c0_i32 = arith.constant 0 : i32
    %c0_i32_0 = arith.constant 0 : i32
    return %arg0, %c0_i32 : i32, i32
  }
  func.func @transform_1(%arg0: i32) -> (i32, i32) {
    %c0_i32 = arith.constant 0 : i32
    %c0_i32_0 = arith.constant 0 : i32
    %c0_i32_1 = arith.constant 0 : i32
    return %c0_i32, %c0_i32_0 : i32, i32
  }
  func.func @transform_2(%arg0: i32) -> (i32, i32) {
    %c0_i32 = arith.constant 0 : i32
    %c0_i32_0 = arith.constant 0 : i32
    %c0_i32_1 = arith.constant 0 : i32
    return %c0_i32, %c0_i32_0 : i32, i32
  }
  func.func @transform_3(%arg0: i32) -> (i32, i32) {
    %c0_i32 = arith.constant 0 : i32
    %c0_i32_0 = arith.constant 0 : i32
    %c0_i32_1 = arith.constant 0 : i32
    return %c0_i32, %c0_i32_0 : i32, i32
  }
  func.func @transform_4(%arg0: i32) -> (i32, i32) {
    %c0_i32 = arith.constant 0 : i32
    %c0_i32_0 = arith.constant 0 : i32
    %c0_i32_1 = arith.constant 0 : i32
    return %c0_i32, %c0_i32_0 : i32, i32
  }
  func.func @transform_5(%arg0: i32) -> (i32, i32) {
    %c0_i32 = arith.constant 0 : i32
    %c0_i32_0 = arith.constant 0 : i32
    return %arg0, %c0_i32 : i32, i32
  }
}

</mosaic_0001>

<bundles_post_ra>
// kernel: tpu_custom_call.1
= control target key start
LH: loop header
LB: loop body
LE: loop exit
PB: predicated region body
PF: predicated region fallthrough
CT: control target
= control target key end

     0   :  { %10 = vsyncpa [#allocation3], 0  ;;  %s2205_s0 = inlined_call_operand.hbm [shape: f32[64,256], index: 0, kind: input, shape index: {}]   ;;  %s2206_s1 = inlined_call_operand.hbm [shape: bf16[256,512], index: 1, kind: input, shape index: {}]   ;;  %s2207_s2 = inlined_call_operand.vmem [shape: f32[1,512], index: 2, kind: input, shape index: {}]   ;;  %s2208_s3 = inlined_call_operand.hbm [shape: bf16[512,128], index: 3, kind: input, shape index: {}]   ;;  %s2209_s4 = inlined_call_operand.vmem [shape: f32[1,128], index: 4, kind: input, shape index: {}]   ;;  %s2210_s5 = inlined_call_operand.hbm [shape: bf16[64,128], index: 5, kind: output, shape index: {}]  }
   0x1   :  { %12 = vsyncpa [#allocation3 + $0x1], 0 }
   0x2   :  { %13 = vsyncpa [#allocation6], 0 }
   0x3   :  { %14 = vsyncpa [#allocation4], 0 }
   0x4   :  { %16 = vsyncpa [#allocation4 + $0x1], 0  ;;  %s1948_s18 = smov 0   ;;  %s1950_s19 = smov 0  }
   0x5   :  { %s1952_s20 = smov 0   ;;  %s1954_s21 = smov 0  }
   0x6 LB: > { %s1969_s22 = sadd.s32 4294967295, %s1906_s21   ;;  %s1335_s23 = sadd.s32 4294967294, %s1906_s21   ;;  %s1906_s21 = sphi %s1954_s21, %s2230_s21   ;;  %s1902_s20 = sphi %s1952_s20, %s2229_s20   ;;  %s1898_s19 = sphi %s1950_s19, %s2228_s19   ;;  %s1894_s18 = sphi %s1948_s18, %s2227_s18  }
   0x7   : > { %p42_p0 = scmp.ne.s32.totalorder %s1898_s19, %s1894_s18  ;;  %p2211_p1 = scmp.eq.s32.totalorder %s1969_s22, 0 }
   0x8   : > { %p156_p3 = scmp.eq.s32.totalorder %s1335_s23, 1  ;;  %p1336_p5 = scmp.ge.s32.totalorder %s1906_s21, 1 }
   0x9   : > { %p1978_p4 = por %p2211_p1, %p42_p0  ;;  %p163_p7 = scmp.lt.s32.totalorder %s1906_s21, 3 }
   0xa   : > { %p1983_p6 = por %p156_p3, %p42_p0  ;;  %s1908_s27 = smov [#allocation5]  }
   0xb   : > { %s2214_s24 = scalar_select %p1978_p4, 1, 0 }
   0xc   : > { %s2215_s25 = scalar_select %p1983_p6, 1, 0 }
   0xd   : > { %p1988_p8 = pnand %p1336_p5, %p163_p7  ;;  %s175_s28 = sshll.u32 %s1908_s27, 4  ;;  %s1992_s28 = int_to_ptr.vmem [resolvable:$true] %s175_s28 }
   0xe   : > { %s1909_s30 = smov [#allocation7]   ;;  %s1750_s9 = scalar_lea.hbm %s2206_s1, 8192 }
   0xf   : > { %p1545_p9 = pneg %p1988_p8  ;;  %s191_s6 = sshll.u32 %s1909_s30, 4  ;;  %s2003_s6 = int_to_ptr.vmem [resolvable:$true] %s191_s6 }
  0x10   : > { %p1751_p12 = scmp.ne.s32.totalorder %s2206_s1, %s1750_s9  ;;  %p1757_p5 = scmp.lt.u32.totalorder %s1750_s9, %s2206_s1 }
  0x11   : > { %p1999_p11 = pnand %p1545_p9, %p2211_p1 }
  0x13   : > { %p1752_p13 = pneg %p1999_p11 }
  0x15   : > { %p1753_p0 = pnand %p1752_p13, %p1751_p12 }
  0x17   : > { %p1754_p3 = pneg %p1753_p0 }
  0x19   : > { %p1759_p7 = pnand %p1757_p5, %p1754_p3 }
  0x1b   : > { %1762 = shalt.err (!%p1759_p7)
}
  0x1c   : > { %s1763_s14 = scalar_lea.vmem %s1992_s28, 8192  ;;  %p1771_p2 = scmp.lt.s32.totalorder %s1992_s28, %s1992_s28 }
  0x1d   : > { %p1764_p9 = scmp.ne.s32.totalorder %s1992_s28, %s1763_s14  ;;  %p1772_p12 = scmp.lt.s32.totalorder %s1763_s14, %s1763_s14 }
  0x1f   : > { %p1766_p10 = pnand %p1764_p9, %p1752_p13  ;;  %p1773_p0 = por %p1772_p12, %p1771_p2 }
  0x21   : > { %p1767_p1 = pneg %p1766_p10 }
  0x23   : > { %p1774_p6 = pnand %p1773_p0, %p1767_p1 }
  0x25   : > { %1777 = shalt.err (!%p1774_p6)
}
  0x26   : > { %s1910_s15 = smov 256   ;;  %s1911_s16 = smov 16  }
  0x27   : > { %1548 = dma.hbm_to_vmem [thread:$0]  (!%p1999_p11), %s2206_s1, 8192, %s1992_s28, [#allocation6], %s1910_s15, %s1910_s15, %s1911_s16  }
  0x28   : > { %s1778_s7 = scalar_lea.hbm %s2208_s3, 4096 }
  0x29   : > { %p1779_p1 = scmp.ne.s32.totalorder %s2208_s3, %s1778_s7  ;;  %p1785_p10 = scmp.lt.u32.totalorder %s1778_s7, %s2208_s3 }
  0x2b   : > { %p1781_p2 = pnand %p1779_p1, %p1752_p13 }
  0x2d   : > { %p1782_p6 = pneg %p1781_p2 }
  0x2f   : > { %p1787_p3 = pnand %p1785_p10, %p1782_p6 }
  0x31   : > { %1790 = shalt.err (!%p1787_p3)
}
  0x32   : > { %s1791_s28 = scalar_lea.vmem %s2003_s6, 4096  ;;  %p1799_p12 = scmp.lt.s32.totalorder %s2003_s6, %s2003_s6 }
  0x33   : > { %p1792_p5 = scmp.ne.s32.totalorder %s2003_s6, %s1791_s28  ;;  %p1800_p0 = scmp.lt.s32.totalorder %s1791_s28, %s1791_s28 }
  0x35   : > { %p1794_p7 = pnand %p1792_p5, %p1752_p13  ;;  %p1801_p1 = por %p1800_p0, %p1799_p12 }
  0x37   : > { %p1795_p9 = pneg %p1794_p7 }
  0x39   : > { %p1802_p2 = pnand %p1801_p1, %p1795_p9 }
  0x3b   : > { %1805 = shalt.err (!%p1802_p2)
}
  0x3c   : > { %s1912_s12 = smov 64   ;;  %s1913_s13 = smov 4  }
  0x3d   : > { %1551 = dma.hbm_to_vmem [thread:$0]  (!%p1999_p11), %s2208_s3, 4096, %s2003_s6, [#allocation6], %s1912_s12, %s1912_s12, %s1913_s13  }
  0x3e   : > { %s2061_s23 = sadd.s32 1, %s1906_s21   ;;  %s29_s30 = sadd.s32 1, %s1902_s20 }
  0x3f   : > { %s26_s27 = ssub.s32 %s1906_s21, %s2061_s23  ;;  %p36_p6 = scmp.ne.s32.totalorder %s1902_s20, %s1898_s19 }
  0x40   : > { %p27_p13 = scmp.eq.s32.totalorder %s26_s27, 0  ;;  %p37_p10 = scmp.eq.s32.totalorder %s1906_s21, 0 }
  0x41   : > { %p2218_p5 = scmp.eq.s32.totalorder %s1969_s22, 1  ;;  %p1562_p9 = scmp.lt.s32.totalorder %s1906_s21, 2 }
  0x42   : > { %s2070_s7 = scalar_select %p27_p13, %s1902_s20, %s29_s30  }
  0x43   : > { %p38_p3 = por %p37_p10, %p36_p6  ;;  %p2074_p7 = por %p2218_p5, %p36_p6 }
  0x44   : > { %s208_s29 = sand.u32 1, %s1902_s20   ;;  %s1460_s6 = sshll.u32 %s1906_s21, 10 }
  0x45   : > { %s2219_s8 = scalar_select %p2074_p7, 1, 0 }
  0x46   : > { %s1340_s9 = sshll.u32 %s208_s29, 6  ;;  %s2084_s28 = scalar_lea.hbm %s2205_s0, %s1460_s6 }
  0x47   : > { %s212_s12 = scalar_lea.vmem [#allocation2], %s1340_s9  ;;  %p2088_p11 = pnand %p1562_p9, %p38_p3 }
  0x48   : > { %s220_s13 = sshll.u32 %s212_s12, 4  ;;  %s2092_s17 = scalar_lea.sflag [#allocation3], %s208_s29  ;;  %s2086_s13 = int_to_ptr.vmem [resolvable:$true] %s220_s13 }
  0x49   : > { %s1806_s27 = scalar_lea.hbm %s2084_s28, 1024  ;;  %p1808_p0 = pneg %p2088_p11 }
  0x4a   : > { %p1807_p12 = scmp.ne.s32.totalorder %s2084_s28, %s1806_s27  ;;  %s1811_s6 = scalar_lea.hbm %s2205_s0, 2048 }
  0x4b   : > { %p1812_p13 = scmp.lt.u32.totalorder %s2084_s28, %s2205_s0  ;;  %p1813_p6 = scmp.lt.u32.totalorder %s1811_s6, %s1806_s27 }
  0x4c   : > { %p1809_p1 = pnand %p1808_p0, %p1807_p12  ;;  %p1815_p3 = scmp.lt.u32.totalorder %s1806_s27, %s2084_s28 }
  0x4d   : > { %p1814_p10 = por %p1813_p6, %p1812_p13 }
  0x4e   : > { %p1810_p2 = pneg %p1809_p1 }
  0x4f   : > { %p1816_p5 = por %p1815_p3, %p1814_p10 }
  0x51   : > { %p1817_p9 = pnand %p1816_p5, %p1810_p2 }
  0x53   : > { %1820 = shalt.err (!%p1817_p9)
}
  0x54   : > { %s1821_s29 = scalar_lea.vmem %s2086_s13, 1024  ;;  %s1914_s12 = smov [#allocation2]  }
  0x55   : > { %p1822_p12 = scmp.ne.s32.totalorder %s2086_s13, %s1821_s29  ;;  %s1826_s30 = sshll.u32 %s1914_s12, 4  ;;  %s1827_s30 = int_to_ptr.vmem [resolvable:$false] %s1826_s30 }
  0x56   : > { %s1828_s9 = scalar_lea.vmem %s1827_s30, 2048  ;;  %p1829_p4 = scmp.lt.s32.totalorder %s2086_s13, %s1827_s30 }
  0x57   : > { %p1824_p1 = pnand %p1822_p12, %p1808_p0  ;;  %p1830_p13 = scmp.lt.s32.totalorder %s1828_s9, %s1821_s29 }
  0x59   : > { %p1825_p7 = pneg %p1824_p1  ;;  %p1831_p6 = por %p1830_p13, %p1829_p4 }
  0x5b   : > { %p1832_p10 = pnand %p1831_p6, %p1825_p7 }
  0x5d   : > { %1835 = shalt.err (!%p1832_p10)
}
  0x5e   : > { %1555 = dma.hbm_to_vmem [thread:$0]  (!%p2088_p11), %s2084_s28, 1024, %s2086_s13, %s2092_s17, %s1910_s15, %s1910_s15, %s1911_s16  }
  0x5f   : > { %232 = sbr.rel (%p1988_p8) target bundleno = 665 (0x299), region = 40  ;;  %s2126_s27 = sand.u32 (!%p1988_p8), 1, %s1898_s19  }
  0x60   : > { %s1345_s6 = sshll.u32 (!%p1988_p8), %s2126_s27, 6  ;;  %s235_s10 = scalar_lea.sflag (!%p1988_p8), [#allocation3], %s2126_s27 }
  0x61   : > { %s2130_s11 = scalar_lea.vmem (!%p1988_p8), [#allocation2], %s1345_s6  ;;  %p2221_p4 = scmp.ne.s32.totalorder (!%p1988_p8), %s2214_s24, 0 }
  0x66   : > { %1881 = dma.done.wait (%p2221_p4), %s235_s10, 1024  }
  0x67   : > { %1883 = vsyncadd (%p2221_p4), %s235_s10, 4294966272  ;;  %p2222_p7 = scmp.eq.s32.totalorder %s1969_s22, 0 }
  0x69   : > { %1885 = dma.done.wait (%p2222_p7), [#allocation6], 12288   ;;  %p2223_p8 = pmov %p2222_p7 }
  0x6a   : > { %v1606_v0 = vld [vmem:[#allocation5 + $0x4] ss:$16 sps:$4 sm:$0xff]   ;;  %v1608_v1 = vld [vmem:[#allocation5 + $0xc] ss:$16 sps:$4 sm:$0xff]   ;;  %v1610_v2 = vld [vmem:[#allocation5] ss:$16 sps:$4 sm:$0xff]  }
  0x6b   : > { %1887 = vsyncadd (%p2223_p8), [#allocation6], 4294955008  ;;  %758 = vmatprep.subr.bf16.mxu0 %v1606_v0  ;;  %v1611_v3 = vld [vmem:[#allocation5 + $0x8] ss:$16 sps:$4 sm:$0xff]   ;;  %811 = vmatprep.subr.bf16.mxu1 %v1608_v1  ;;  %v1612_v4 = vld [vmem:[#allocation5 + $0x24] ss:$16 sps:$4 sm:$0xff]  }
  0x6c   : > { %759 = vmatpush1.bf16.msra.mxu0 %v1610_v2  ;;  %812 = vmatpush1.bf16.msra.mxu1 %v1611_v3  ;;  %v1614_v5 = vld [vmem:[#allocation5 + $0x2c] ss:$16 sps:$4 sm:$0xff]   ;;  %v1616_v6 = vld [vmem:[#allocation5 + $0x20] ss:$16 sps:$4 sm:$0xff]   ;;  %v1617_v7 = vld [vmem:[#allocation5 + $0x28] ss:$16 sps:$4 sm:$0xff]  }
  0x6d   : > { %760 = vmatprep.subr.bf16.mxu0 %v1612_v4  ;;  %813 = vmatprep.subr.bf16.mxu1 %v1614_v5  ;;  %v1618_v8 = vld [vmem:[#allocation5 + $0x44] ss:$16 sps:$4 sm:$0xff]   ;;  %v1620_v9 = vld [vmem:[#allocation5 + $0x4c] ss:$16 sps:$4 sm:$0xff]   ;;  %v1622_v10 = vld [vmem:[#allocation5 + $0x40] ss:$16 sps:$4 sm:$0xff]  }
  0x6e   : > { %v1623_v11 = vld [vmem:[#allocation5 + $0x48] ss:$16 sps:$4 sm:$0xff]   ;;  %v1624_v12 = vld [vmem:[#allocation5 + $0x64] ss:$16 sps:$4 sm:$0xff]   ;;  %v1626_v13 = vld [vmem:[#allocation5 + $0x6c] ss:$16 sps:$4 sm:$0xff]  }
  0x6f   : > { %v1628_v14 = vld [vmem:[#allocation5 + $0x60] ss:$16 sps:$4 sm:$0xff]   ;;  %v1629_v15 = vld [vmem:[#allocation5 + $0x68] ss:$16 sps:$4 sm:$0xff]   ;;  %v1630_v16 = vld [vmem:[#allocation5 + $0x84] ss:$16 sps:$4 sm:$0xff]  }
  0x70   : > { %761 = vmatpush1.bf16.msra.mxu0 %v1616_v6  ;;  %814 = vmatpush1.bf16.msra.mxu1 %v1617_v7  ;;  %v1632_v17 = vld [vmem:[#allocation5 + $0x8c] ss:$16 sps:$4 sm:$0xff]   ;;  %v1634_v18 = vld [vmem:[#allocation5 + $0x80] ss:$16 sps:$4 sm:$0xff]   ;;  %v1635_v19 = vld [vmem:[#allocation5 + $0x88] ss:$16 sps:$4 sm:$0xff]  }
  0x71   : > { %762 = vmatprep.subr.bf16.mxu0 %v1618_v8  ;;  %815 = vmatprep.subr.bf16.mxu1 %v1620_v9  ;;  %v1636_v20 = vld [vmem:[#allocation5 + $0xa4] ss:$16 sps:$4 sm:$0xff]   ;;  %v1638_v21 = vld [vmem:[#allocation5 + $0xac] ss:$16 sps:$4 sm:$0xff]   ;;  %v1640_v22 = vld [vmem:[#allocation5 + $0xa0] ss:$16 sps:$4 sm:$0xff]  }
  0x72   : > { %v1641_v23 = vld [vmem:[#allocation5 + $0xa8] ss:$16 sps:$4 sm:$0xff]   ;;  %v1642_v24 = vld [vmem:[#allocation5 + $0xc4] ss:$16 sps:$4 sm:$0xff]   ;;  %v1644_v25 = vld [vmem:[#allocation5 + $0xcc] ss:$16 sps:$4 sm:$0xff]  }
  0x73   : > { %v1646_v26 = vld [vmem:[#allocation5 + $0xc0] ss:$16 sps:$4 sm:$0xff]   ;;  %v1647_v27 = vld [vmem:[#allocation5 + $0xc8] ss:$16 sps:$4 sm:$0xff]   ;;  %v1648_v28 = vld [vmem:[#allocation5 + $0xe4] ss:$16 sps:$4 sm:$0xff]  }
  0x74   : > { %763 = vmatpush1.bf16.msra.mxu0 %v1622_v10  ;;  %816 = vmatpush1.bf16.msra.mxu1 %v1623_v11  ;;  %v1650_v29 = vld [vmem:[#allocation5 + $0xec] ss:$16 sps:$4 sm:$0xff]   ;;  %v1652_v30 = vld [vmem:[#allocation5 + $0xe0] ss:$16 sps:$4 sm:$0xff]   ;;  %v1653_v31 = vld [vmem:[#allocation5 + $0xe8] ss:$16 sps:$4 sm:$0xff]  }
  0x75   : > { %764 = vmatprep.subr.bf16.mxu0 %v1624_v12  ;;  %817 = vmatprep.subr.bf16.mxu1 %v1626_v13  ;;  %v1654_v32 = vld [vmem:[#allocation5 + $0x104] ss:$16 sps:$4 sm:$0xff]   ;;  %v1656_v33 = vld [vmem:[#allocation5 + $0x10c] ss:$16 sps:$4 sm:$0xff]   ;;  %v1658_v34 = vld [vmem:[#allocation5 + $0x100] ss:$16 sps:$4 sm:$0xff]  }
  0x76   : > { %v1659_v35 = vld [vmem:[#allocation5 + $0x108] ss:$16 sps:$4 sm:$0xff]   ;;  %v1660_v36 = vld [vmem:[#allocation5 + $0x124] ss:$16 sps:$4 sm:$0xff]   ;;  %v1662_v37 = vld [vmem:[#allocation5 + $0x12c] ss:$16 sps:$4 sm:$0xff]  }
  0x77   : > { %v1664_v38 = vld [vmem:[#allocation5 + $0x120] ss:$16 sps:$4 sm:$0xff]   ;;  %v1665_v39 = vld [vmem:[#allocation5 + $0x128] ss:$16 sps:$4 sm:$0xff]   ;;  %v1666_v40 = vld [vmem:[#allocation5 + $0x144] ss:$16 sps:$4 sm:$0xff]  }
  0x78   : > { %765 = vmatpush1.bf16.msra.mxu0 %v1628_v14  ;;  %818 = vmatpush1.bf16.msra.mxu1 %v1629_v15  ;;  %v1668_v41 = vld [vmem:[#allocation5 + $0x14c] ss:$16 sps:$4 sm:$0xff]   ;;  %v1670_v42 = vld [vmem:[#allocation5 + $0x140] ss:$16 sps:$4 sm:$0xff]   ;;  %v1671_v43 = vld [vmem:[#allocation5 + $0x148] ss:$16 sps:$4 sm:$0xff]  }
  0x79   : > { %766 = vmatprep.subr.bf16.mxu0 %v1630_v16  ;;  %819 = vmatprep.subr.bf16.mxu1 %v1632_v17  ;;  %v1672_v44 = vld [vmem:[#allocation5 + $0x164] ss:$16 sps:$4 sm:$0xff]   ;;  %v1674_v45 = vld [vmem:[#allocation5 + $0x16c] ss:$16 sps:$4 sm:$0xff]   ;;  %v1676_v48 = vld [vmem:[#allocation5 + $0x160] ss:$16 sps:$4 sm:$0xff]  }
  0x7a   : > { %v405_v46 = vld [vmem:[%s2130_s11 + $0x8] sm:$0xff]  ;;  %v407_v47 = vld [vmem:[%s2130_s11 + $0x18] sm:$0xff]  ;;  %v1678_v50 = vld [vmem:[#allocation5 + $0x184] ss:$16 sps:$4 sm:$0xff]   ;;  %s1348_s28 = sshll.u32 %s2126_s27, 4  ;;  %s1465_s14 = sshll.u32 %s1969_s22, 8 }
  0x7b   : > { %v1677_v49 = vld [vmem:[#allocation5 + $0x168] ss:$16 sps:$4 sm:$0xff]   ;;  %v413_v51 = vpack.c.bf16 %v407_v47, %v405_v46  ;;  %v1680_v52 = vld [vmem:[#allocation5 + $0x18c] ss:$16 sps:$4 sm:$0xff]   ;;  %v1682_v53 = vld [vmem:[#allocation5 + $0x180] ss:$16 sps:$4 sm:$0xff]   ;;  %s2159_s30 = scalar_lea.hbm %s2210_s5, %s1465_s14 }
  0x7c   : > { %767 = vmatpush1.bf16.msra.mxu0 %v1634_v18  ;;  %820 = vmatpush1.bf16.msra.mxu1 %v1635_v19  ;;  %v1683_v54 = vld [vmem:[#allocation5 + $0x188] ss:$16 sps:$4 sm:$0xff]   ;;  %v1684_v55 = vld [vmem:[#allocation5 + $0x1a4] ss:$16 sps:$4 sm:$0xff]   ;;  %v1686_v56 = vld [vmem:[#allocation5 + $0x1ac] ss:$16 sps:$4 sm:$0xff]  }
  0x7d   : > { %768 = vmatprep.subr.bf16.mxu0 %v1636_v20  ;;  %821 = vmatprep.subr.bf16.mxu1 %v1638_v21  ;;  %v1688_v57 = vld [vmem:[#allocation5 + $0x1a0] ss:$16 sps:$4 sm:$0xff]   ;;  %v1689_v58 = vld [vmem:[#allocation5 + $0x1a8] ss:$16 sps:$4 sm:$0xff]   ;;  %v1690_v59 = vld [vmem:[#allocation5 + $0x1c4] ss:$16 sps:$4 sm:$0xff]  }
  0x7e   : > { %790 = vmatprep.mubr.bf16.mxu0 %v413_v51  ;;  %843 = vmatprep.mubr.bf16.mxu1 %v413_v51  ;;  %v1692_v60 = vld [vmem:[#allocation5 + $0x1cc] ss:$16 sps:$4 sm:$0xff]   ;;  %v1694_v61 = vld [vmem:[#allocation5 + $0x1c0] ss:$16 sps:$4 sm:$0xff]   ;;  %v1695_v62 = vld [vmem:[#allocation5 + $0x1c8] ss:$16 sps:$4 sm:$0xff]  }
  0x7f   : > { %v1696_v63 = vld [vmem:[#allocation5 + $0x1e4] ss:$16 sps:$4 sm:$0xff]   ;;  %v1698_v0 = vld [vmem:[#allocation5 + $0x1ec] ss:$16 sps:$4 sm:$0xff]   ;;  %v1700_v1 = vld [vmem:[#allocation5 + $0x1e0] ss:$16 sps:$4 sm:$0xff]  }
  0x80   : > { %769 = vmatpush1.bf16.msra.mxu0 %v1640_v22  ;;  %822 = vmatpush1.bf16.msra.mxu1 %v1641_v23  ;;  %v1701_v2 = vld [vmem:[#allocation5 + $0x1e8] ss:$16 sps:$4 sm:$0xff]   ;;  %v404_v3 = vld [vmem:[%s2130_s11] sm:$0xff]  ;;  %v406_v4 = vld [vmem:[%s2130_s11 + $0x10] sm:$0xff]  ;;  %s272_s13 = scalar_lea.vmem [#allocation8], %s1348_s28  ;;  %s1230_s9 = scalar_lea.sflag [#allocation4], %s2126_s27 }
  0x81   : > { %770 = vmatprep.subr.bf16.mxu0 %v1642_v24  ;;  %823 = vmatprep.subr.bf16.mxu1 %v1644_v25  ;;  %v409_v5 = vld [vmem:[%s2130_s11 + $0x28] sm:$0xff]  ;;  %v411_v6 = vld [vmem:[%s2130_s11 + $0x38] sm:$0xff]  ;;  %v1702_v7 = vld [vmem:[#allocation7 + $0x40] sm:$0xff]   ;;  %v412_v9 = vpack.c.bf16 %v406_v4, %v404_v3  ;;  %s1243_s17 = sshll.u32 %s272_s13, 4  ;;  %p2224_p0 = scmp.ne.s32.totalorder %s2219_s8, 0  ;;  %s2161_s17 = int_to_ptr.vmem [resolvable:$true] %s1243_s17 }
  0x82   : > { %v1703_v8 = vld [vmem:[#allocation7 + $0xc0] sm:$0xff]   ;;  %v415_v11 = vpack.c.bf16 %v411_v6, %v409_v5  ;;  %v1706_v13 = vld [vmem:[#allocation7 + $0x48] sm:$0xff]   ;;  %v410_v15 = vld [vmem:[%s2130_s11 + $0x30] sm:$0xff]  ;;  %s1836_s6 = scalar_lea.vmem %s2161_s17, 256  ;;  %s1915_s22 = smov [#allocation8]  }
  0x83   : > { %v1704_v10 = vld [vmem:[#allocation7] sm:$0xff]   ;;  %v1707_v16 = vld [vmem:[#allocation7 + $0xc8] sm:$0xff]   ;;  %v1710_v19 = vld [vmem:[#allocation7 + $0x50] sm:$0xff]   ;;  %p1837_p11 = scmp.ne.s32.totalorder %s2161_s17, %s1836_s6  ;;  %s1840_s10 = sshll.u32 %s1915_s22, 4  ;;  %s1841_s10 = int_to_ptr.vmem [resolvable:$false] %s1840_s10 }
  0x84   : > { %771 = vmatpush1.bf16.msra.mxu0 %v1646_v26  ;;  %824 = vmatpush1.bf16.msra.mxu1 %v1647_v27  ;;  %v1705_v12 = vld [vmem:[#allocation7 + $0x80] sm:$0xff]   ;;  %v1708_v17 = vld [vmem:[#allocation7 + $0x8] sm:$0xff]   ;;  %v1711_v20 = vld [vmem:[#allocation7 + $0xd0] sm:$0xff]   ;;  %p1843_p5 = scmp.lt.s32.totalorder %s2161_s17, %s1841_s10 }
  0x85   : > { %772 = vmatprep.subr.bf16.mxu0 %v1648_v28  ;;  %825 = vmatprep.subr.bf16.mxu1 %v1650_v29  ;;  %v408_v14 = vld [vmem:[%s2130_s11 + $0x20] sm:$0xff]  ;;  %v1709_v18 = vld [vmem:[#allocation7 + $0x88] sm:$0xff]   ;;  %v1712_v22 = vld [vmem:[#allocation7 + $0x10] sm:$0xff]   ;;  %p1838_p2 = pnand %p1837_p11, %p2224_p0  ;;  %s1842_s11 = scalar_lea.vmem %s1841_s10, 512 }
  0x86   : > { %v414_v21 = vpack.c.bf16 %v410_v15, %v408_v14  ;;  %v1713_v23 = vld [vmem:[#allocation7 + $0x90] sm:$0xff]   ;;  %v1714_v24 = vld [vmem:[#allocation7 + $0x58] sm:$0xff]   ;;  %v1718_v28 = vld [vmem:[#allocation7 + $0x60] sm:$0xff]   ;;  %p1844_p9 = scmp.lt.s32.totalorder %s1842_s11, %s1836_s6 }
  0x87   : > { %v1715_v25 = vld [vmem:[#allocation7 + $0xd8] sm:$0xff]   ;;  %v1719_v29 = vld [vmem:[#allocation7 + $0xe0] sm:$0xff]   ;;  %p1839_p3 = pneg %p1838_p2 }
  0x88   : > { %773 = vmatpush1.bf16.msra.mxu0 %v1652_v30  ;;  %826 = vmatpush1.bf16.msra.mxu1 %v1653_v31  ;;  %v1716_v26 = vld [vmem:[#allocation7 + $0x18] sm:$0xff]   ;;  %v1720_v30 = vld [vmem:[#allocation7 + $0x20] sm:$0xff]   ;;  %p1845_p12 = por %p1844_p9, %p1843_p5 }
  0x89   : > { %774 = vmatprep.subr.bf16.mxu0 %v1654_v32  ;;  %827 = vmatprep.subr.bf16.mxu1 %v1656_v33  ;;  %v1717_v27 = vld [vmem:[#allocation7 + $0x98] sm:$0xff]   ;;  %v1721_v31 = vld [vmem:[#allocation7 + $0xa0] sm:$0xff]   ;;  %v1722_v32 = vld [vmem:[#allocation7 + $0x68] sm:$0xff]  }
  0x8a   : > { %v1723_v33 = vld [vmem:[#allocation7 + $0xe8] sm:$0xff]   ;;  %p1846_p1 = pnand %p1845_p12, %p1839_p3 }
  0x8c   : > { %775 = vmatpush1.bf16.msra.mxu0 %v1658_v34  ;;  %828 = vmatpush1.bf16.msra.mxu1 %v1659_v35  ;;  %v1724_v34 = vld [vmem:[#allocation7 + $0x28] sm:$0xff]  }
  0x8d   : > { %776 = vmatprep.subr.bf16.mxu0 %v1660_v36  ;;  %829 = vmatprep.subr.bf16.mxu1 %v1662_v37  ;;  %v1725_v35 = vld [vmem:[#allocation7 + $0xa8] sm:$0xff]   ;;  %v1726_v36 = vld [vmem:[#allocation7 + $0x70] sm:$0xff]  }
  0x8e   : > { %v1727_v37 = vld [vmem:[#allocation7 + $0xf0] sm:$0xff]  }
  0x90   : > { %777 = vmatpush1.bf16.msra.mxu0 %v1664_v38  ;;  %830 = vmatpush1.bf16.msra.mxu1 %v1665_v39  ;;  %v1728_v38 = vld [vmem:[#allocation7 + $0x30] sm:$0xff]  }
  0x91   : > { %778 = vmatprep.subr.bf16.mxu0 %v1666_v40  ;;  %831 = vmatprep.subr.bf16.mxu1 %v1668_v41  ;;  %v1729_v39 = vld [vmem:[#allocation7 + $0xb0] sm:$0xff]   ;;  %v1730_v40 = vld [vmem:[#allocation7 + $0x78] sm:$0xff]  }
  0x92   : > { %v1731_v41 = vld [vmem:[#allocation7 + $0xf8] sm:$0xff]  }
  0x94   : > { %779 = vmatpush1.bf16.msra.mxu0 %v1670_v42  ;;  %832 = vmatpush1.bf16.msra.mxu1 %v1671_v43  ;;  %v1732_v42 = vld [vmem:[#allocation7 + $0x38] sm:$0xff]  }
  0x95   : > { %780 = vmatprep.subr.bf16.mxu0 %v1672_v44  ;;  %833 = vmatprep.subr.bf16.mxu1 %v1674_v45  ;;  %v1733_v43 = vld [vmem:[#allocation7 + $0xb8] sm:$0xff]   ;;  %v418_v44 = vlaneseq }
  0x97   : > { %v419_v45 = vshrl.u32 %v418_v44, 7 }
  0x98   : > { %781 = vmatpush1.bf16.msra.mxu0 %v1676_v48  ;;  %834 = vmatpush1.bf16.msra.mxu1 %v1677_v49  ;;  %v416_v48 = vld [vmem:[%s2207_s2] sm:$0xf] }
  0x99   : > { %782 = vmatprep.subr.bf16.mxu0 %v1678_v50  ;;  %835 = vmatprep.subr.bf16.mxu1 %v1680_v52  ;;  %v420_v46 = vsub.s32 0, %v419_v45  ;;  %v428_v47 = vsub.s32 2, %v419_v45  ;;  %v424_v49 = vsub.s32 1, %v419_v45  ;;  %v432_v50 = vsub.s32 3, %v419_v45 }
  0x9b   : > { %v421_v51 = vrot.slane %v416_v48, %v420_v46  ;;  %v429_v52 = vrot.slane %v416_v48, %v428_v47 }
  0x9c   : > { %783 = vmatpush1.bf16.msra.mxu0 %v1682_v53  ;;  %836 = vmatpush1.bf16.msra.mxu1 %v1683_v54  ;;  %v425_v53 = vrot.slane %v416_v48, %v424_v49  ;;  %v433_v54 = vrot.slane %v416_v48, %v432_v50  ;;  %v1413_v49 = vld [vmem:[%s2209_s4] ss:$0 sm:$0xff] }
  0x9d   : > { %784 = vmatprep.subr.bf16.mxu0 %v1684_v55  ;;  %837 = vmatprep.subr.bf16.mxu1 %v1686_v56 }
  0xa0   : > { %785 = vmatpush1.bf16.msra.mxu0 %v1688_v57  ;;  %838 = vmatpush1.bf16.msra.mxu1 %v1689_v58 }
  0xa1   : > { %786 = vmatprep.subr.bf16.mxu0 %v1690_v59  ;;  %839 = vmatprep.subr.bf16.mxu1 %v1692_v60 }
  0xa4   : > { %787 = vmatpush1.bf16.msra.mxu0 %v1694_v61  ;;  %840 = vmatpush1.bf16.msra.mxu1 %v1695_v62 }
  0xa5   : > { %788 = vmatprep.subr.bf16.mxu0 %v1696_v63  ;;  %841 = vmatprep.subr.bf16.mxu1 %v1698_v0 }
  0xa8   : > { %789 = vmatpush1.bf16.msra.mxu0 %v1700_v1  ;;  %842 = vmatpush1.bf16.msra.mxu1 %v1701_v2 }
  0xa9   : > { %1477 = vmatprep.subr.bf16.mxu0 %v1702_v7  ;;  %1505 = vmatprep.subr.bf16.mxu1 %v1703_v8 }
  0xab   : > { %791 = vmatmul.mubr.bf16.vlgmr.msra.gmra.mrb[0].mxu0 %v412_v9  ;;  %844 = vmatmul.mubr.bf16.vlgmr.msra.gmra.mrb[0].mxu1 %v412_v9 }
  0xac   : > { %800 = vmatprep.mubr.bf16.mxu0 %v415_v11  ;;  %853 = vmatprep.mubr.bf16.mxu1 %v415_v11 }
  0xad   : > { %1478 = vmatpush3.bf16.msra.mxu0 %v1704_v10  ;;  %1506 = vmatpush3.bf16.msra.mxu1 %v1705_v12 }
  0xae   : > { %1479 = vmatprep.subr.bf16.mxu0 %v1706_v13  ;;  %1507 = vmatprep.subr.bf16.mxu1 %v1707_v16 }
  0xb1   : > { %1480 = vmatpush3.bf16.msra.mxu0 %v1708_v17  ;;  %1508 = vmatpush3.bf16.msra.mxu1 %v1709_v18 }
  0xb2   : > { %1481 = vmatprep.subr.bf16.mxu0 %v1710_v19  ;;  %1509 = vmatprep.subr.bf16.mxu1 %v1711_v20 }
  0xb3   : > { %801 = vmatmul.mubr.bf16.gmra.mrb[4].mxu0 %v414_v21  ;;  %854 = vmatmul.mubr.bf16.gmra.mrb[4].mxu1 %v414_v21 }
  0xb5   : > { %1482 = vmatpush3.bf16.msra.mxu0 %v1712_v22  ;;  %1510 = vmatpush3.bf16.msra.mxu1 %v1713_v23 }
  0xb6   : > { %1483 = vmatprep.subr.bf16.mxu0 %v1714_v24  ;;  %1511 = vmatprep.subr.bf16.mxu1 %v1715_v25 }
  0xb9   : > { %1484 = vmatpush3.bf16.msra.mxu0 %v1716_v26  ;;  %1512 = vmatpush3.bf16.msra.mxu1 %v1717_v27 }
  0xba   : > { %1485 = vmatprep.subr.bf16.mxu0 %v1718_v28  ;;  %1513 = vmatprep.subr.bf16.mxu1 %v1719_v29 }
  0xbd   : > { %1486 = vmatpush3.bf16.msra.mxu0 %v1720_v30  ;;  %1514 = vmatpush3.bf16.msra.mxu1 %v1721_v31 }
  0xbe   : > { %1487 = vmatprep.subr.bf16.mxu0 %v1722_v32  ;;  %1515 = vmatprep.subr.bf16.mxu1 %v1723_v33 }
  0xc1   : > { %1488 = vmatpush3.bf16.msra.mxu0 %v1724_v34  ;;  %1516 = vmatpush3.bf16.msra.mxu1 %v1725_v35 }
  0xc2   : > { %1489 = vmatprep.subr.bf16.mxu0 %v1726_v36  ;;  %1517 = vmatprep.subr.bf16.mxu1 %v1727_v37 }
  0xc5   : > { %1490 = vmatpush3.bf16.msra.mxu0 %v1728_v38  ;;  %1518 = vmatpush3.bf16.msra.mxu1 %v1729_v39 }
  0xc6   : > { %1491 = vmatprep.subr.bf16.mxu0 %v1730_v40  ;;  %1519 = vmatprep.subr.bf16.mxu1 %v1731_v41 }
  0xc9   : > { %1492 = vmatpush3.bf16.msra.mxu0 %v1732_v42  ;;  %1520 = vmatpush3.bf16.msra.mxu1 %v1733_v43 }
 0x17e   : > { %v792_v55 = vpop.f32.mrb[0].mxu0  ;;  %v845_v56 = vpop.f32.mrb[0].mxu1 }
 0x17f   : > { %v793_v57 = vadd.f32 %v792_v55, %v421_v51  ;;  %v846_v58 = vadd.f32 %v845_v56, %v429_v52  ;;  %v794_v59 = vpop.f32.mrb[1].mxu0  ;;  %v847_v60 = vpop.f32.mrb[1].mxu1 }
 0x180   : > { %v795_v61 = vadd.f32 %v794_v59, %v425_v53  ;;  %v848_v62 = vadd.f32 %v847_v60, %v433_v54  ;;  %v796_v63 = vpop.f32.mrb[2].mxu0  ;;  %v849_v0 = vpop.f32.mrb[2].mxu1 }
 0x181   : > { %v866_v1 = vmax.f32 %v846_v58, 0.0  ;;  %v797_v2 = vadd.f32 %v796_v63, %v421_v51  ;;  %v850_v3 = vadd.f32 %v849_v0, %v429_v52  ;;  %v798_v4 = vpop.f32.mrb[3].mxu0  ;;  %v851_v5 = vpop.f32.mrb[3].mxu1  ;;  %v864_v9 = vmax.f32 %v793_v57, 0.0 }
 0x182   : > { %v867_v6 = vmax.f32 %v848_v62, 0.0  ;;  %v799_v7 = vadd.f32 %v798_v4, %v425_v53  ;;  %v852_v8 = vadd.f32 %v851_v5, %v433_v54  ;;  %v865_v12 = vmax.f32 %v795_v61, 0.0 }
 0x183   : > { %v868_v10 = vmax.f32 %v797_v2, 0.0  ;;  %v870_v11 = vmax.f32 %v850_v3, 0.0 }
 0x184   : > { %v869_v13 = vmax.f32 %v799_v7, 0.0  ;;  %v871_v14 = vmax.f32 %v852_v8, 0.0 }
 0x185   : > { %v880_v15 = vpack.c.bf16 %v868_v10, %v864_v9  ;;  %v882_v16 = vpack.c.bf16 %v870_v11, %v866_v1 }
 0x186   : > { %v881_v17 = vpack.c.bf16 %v869_v13, %v865_v12  ;;  %v883_v18 = vpack.c.bf16 %v871_v14, %v867_v6  ;;  %v802_v19 = vpop.f32.mrb[4].mxu0  ;;  %v855_v20 = vpop.f32.mrb[4].mxu1 }
 0x187   : > { %v803_v21 = vadd.f32 %v802_v19, %v421_v51  ;;  %v856_v22 = vadd.f32 %v855_v20, %v429_v52  ;;  %v804_v23 = vpop.f32.mrb[5].mxu0  ;;  %v857_v24 = vpop.f32.mrb[5].mxu1 }
 0x188   : > { %v805_v25 = vadd.f32 %v804_v23, %v425_v53  ;;  %v858_v26 = vadd.f32 %v857_v24, %v433_v54  ;;  %v806_v27 = vpop.f32.mrb[6].mxu0  ;;  %v859_v28 = vpop.f32.mrb[6].mxu1  ;;  %1119 = vmatprep.mubr.bf16.mxu0 %v881_v17  ;;  %1168 = vmatprep.mubr.bf16.mxu1 %v883_v18 }
 0x189   : > { %v874_v29 = vmax.f32 %v856_v22, 0.0  ;;  %v807_v30 = vadd.f32 %v806_v27, %v421_v51  ;;  %v860_v31 = vadd.f32 %v859_v28, %v429_v52  ;;  %v808_v32 = vpop.f32.mrb[7].mxu0  ;;  %v861_v33 = vpop.f32.mrb[7].mxu1  ;;  %1120 = vmatmul.mubr.bf16.vlgmr.msra.gmra.mrb[8].mxu0 %v880_v15  ;;  %1169 = vmatmul.mubr.bf16.vlgmr.msra.gmra.mrb[8].mxu1 %v882_v16  ;;  %v872_v37 = vmax.f32 %v803_v21, 0.0 }
 0x18a   : > { %v875_v34 = vmax.f32 %v858_v26, 0.0  ;;  %v809_v35 = vadd.f32 %v808_v32, %v425_v53  ;;  %v862_v36 = vadd.f32 %v861_v33, %v433_v54  ;;  %v873_v40 = vmax.f32 %v805_v25, 0.0 }
 0x18b   : > { %v876_v38 = vmax.f32 %v807_v30, 0.0  ;;  %v878_v39 = vmax.f32 %v860_v31, 0.0 }
 0x18c   : > { %v877_v41 = vmax.f32 %v809_v35, 0.0  ;;  %v879_v42 = vmax.f32 %v862_v36, 0.0 }
 0x18d   : > { %v884_v43 = vpack.c.bf16 %v876_v38, %v872_v37  ;;  %v886_v44 = vpack.c.bf16 %v878_v39, %v874_v29 }
 0x18e   : > { %v885_v45 = vpack.c.bf16 %v877_v41, %v873_v40  ;;  %v887_v46 = vpack.c.bf16 %v879_v42, %v875_v34 }
 0x190   : > { %1127 = vmatprep.mubr.bf16.mxu0 %v885_v45  ;;  %1176 = vmatprep.mubr.bf16.mxu1 %v887_v46 }
 0x191   : > { %1128 = vmatmul.mubr.bf16.gmra.mrb[12].mxu0 %v884_v43  ;;  %1177 = vmatmul.mubr.bf16.gmra.mrb[12].mxu1 %v886_v44 }
 0x25c   : > { %v1493_v47 = vpop.f32.mrb[8].mxu0  ;;  %v1521_v48 = vpop.f32.mrb[8].mxu1 }
 0x25d   : > { %v1494_v50 = vpop.f32.mrb[9].mxu0  ;;  %v1522_v51 = vpop.f32.mrb[9].mxu1 }
 0x25e   : > { %v1495_v52 = vadd.f32 %v1494_v50, %v1493_v47  ;;  %v1523_v53 = vadd.f32 %v1522_v51, %v1521_v48  ;;  %v1496_v54 = vpop.f32.mrb[10].mxu0  ;;  %v1524_v55 = vpop.f32.mrb[10].mxu1 }
 0x25f   : > { %v1497_v56 = vpop.f32.mrb[11].mxu0  ;;  %v1525_v57 = vpop.f32.mrb[11].mxu1 }
 0x260   : > { %v1122_v58 = vadd.f32 %v1495_v52, %v1413_v49  ;;  %v1498_v59 = vadd.f32 %v1497_v56, %v1496_v54  ;;  %v1526_v60 = vadd.f32 %v1525_v57, %v1524_v55 }
 0x262   : > { %v1171_v61 = vadd.f32 %v1523_v53, %v1122_v58  ;;  %v1125_v62 = vadd.f32 %v1498_v59, %v1413_v49 }
 0x264   : > { %v1446_v63 = vmul.f32 -1.442695, %v1171_v61  ;;  %v1174_v0 = vadd.f32 %v1526_v60, %v1125_v62  ;;  %v1499_v1 = vpop.f32.mrb[12].mxu0  ;;  %v1527_v2 = vpop.f32.mrb[12].mxu1 }
 0x265   : > { %v1500_v3 = vpop.f32.mrb[13].mxu0  ;;  %v1528_v4 = vpop.f32.mrb[13].mxu1 }
 0x266   : > { %1734 = vpow2.f32 %v1446_v63  ;;  %v1447_v5 = vmul.f32 -1.442695, %v1174_v0  ;;  %v1501_v6 = vadd.f32 %v1500_v3, %v1499_v1  ;;  %v1529_v7 = vadd.f32 %v1528_v4, %v1527_v2  ;;  %v1502_v8 = vpop.f32.mrb[14].mxu0  ;;  %v1530_v9 = vpop.f32.mrb[14].mxu1 }
 0x267   : > { %v1503_v10 = vpop.f32.mrb[15].mxu0  ;;  %v1531_v11 = vpop.f32.mrb[15].mxu1 }
 0x268   : > { %1736 = vpow2.f32 %v1447_v5  ;;  %v1130_v12 = vadd.f32 %v1501_v6, %v1413_v49  ;;  %v1504_v13 = vadd.f32 %v1503_v10, %v1502_v8  ;;  %v1532_v14 = vadd.f32 %v1531_v11, %v1530_v9 }
 0x26a   : > { %v1179_v15 = vadd.f32 %v1529_v7, %v1130_v12  ;;  %v1133_v16 = vadd.f32 %v1504_v13, %v1413_v49 }
 0x26c   : > { %v1448_v17 = vmul.f32 -1.442695, %v1179_v15  ;;  %v1182_v18 = vadd.f32 %v1532_v14, %v1133_v16 }
 0x26e   : > { %1738 = vpow2.f32 %v1448_v17  ;;  %v1449_v19 = vmul.f32 -1.442695, %v1182_v18 }
 0x270   : > { %v1735_v20 = vpop.eup %1734  ;;  %1740 = vpow2.f32 %v1449_v19 }
 0x271   : > { %v1197_v21 = vadd.f32 1.0, %v1735_v20 }
 0x272   : > { %v1737_v22 = vpop.eup %1736 }
 0x273   : > { %v1198_v23 = vadd.f32 1.0, %v1737_v22  ;;  %1742 = vrcp.f32 %v1197_v21 }
 0x275   : > { %1744 = vrcp.f32 %v1198_v23 }
 0x278   : > { %v1739_v24 = vpop.eup %1738 }
 0x279   : > { %v1199_v25 = vadd.f32 1.0, %v1739_v24 }
 0x27a   : > { %v1741_v26 = vpop.eup %1740 }
 0x27b   : > { %v1200_v27 = vadd.f32 1.0, %v1741_v26  ;;  %1746 = vrcp.f32 %v1199_v25 }
 0x27d   : > { %1748 = vrcp.f32 %v1200_v27  ;;  %v1743_v28 = vpop.eup %1742 }
 0x27f   : > { %v1745_v29 = vpop.eup %1744 }
 0x280   : > { %v1469_v30 = vpack.c.bf16 %v1745_v29, %v1743_v28 }
 0x282   : > { %1470 = vst [vmem:[%s272_s13] sm:$0xff] %v1469_v30  }
 0x285   : > { %v1747_v31 = vpop.eup %1746 }
 0x287   : > { %v1749_v32 = vpop.eup %1748 }
 0x288   : > { %v1474_v33 = vpack.c.bf16 %v1749_v32, %v1747_v31 }
 0x28a   : > { %1476 = vst [vmem:[%s272_s13 + $0x8] sm:$0xff] %v1474_v33  }
 0x28b   : > { %1849 = shalt.err (!%p1846_p1)
}
 0x28c   : > { %s1850_s24 = scalar_lea.hbm %s2159_s30, 256  ;;  %s1854_s16 = scalar_lea.hbm %s2210_s5, 512 }
 0x28d   : > { %p1851_p13 = scmp.ne.s32.totalorder %s2159_s30, %s1850_s24  ;;  %p1855_p4 = scmp.lt.u32.totalorder %s2159_s30, %s2210_s5 }
 0x28e   : > { %p1856_p7 = scmp.lt.u32.totalorder %s1854_s16, %s1850_s24  ;;  %p1858_p11 = scmp.lt.u32.totalorder %s1850_s24, %s2159_s30 }
 0x28f   : > { %p1852_p6 = pnand %p1851_p13, %p2224_p0 }
 0x290   : > { %p1857_p8 = por %p1856_p7, %p1855_p4 }
 0x291   : > { %p1853_p10 = pneg %p1852_p6 }
 0x292   : > { %p1859_p2 = por %p1858_p11, %p1857_p8 }
 0x294   : > { %p1860_p3 = pnand %p1859_p2, %p1853_p10 }
 0x296   : > { %1863 = shalt.err (!%p1860_p3)
}
 0x297   : > { %s1916_s14 = smov 64   ;;  %s1917_s29 = smov 4  }
 0x298   : > { %1543 = dma.vmem_to_hbm [thread:$0]  (%p2224_p0), %s2161_s17, 256, %s2159_s30, %s1230_s9, %s1916_s14, %s1916_s14, %s1917_s29  }
 0x299 PF: > { %s1258_s12 = sand.u32 1, %s1894_s18   ;;  %p2225_p5 = scmp.ne.s32.totalorder %s2215_s25, 0 }
 0x29a   : > { %p2226_p9 = scmp.ge.s32.totalorder %s1906_s21, 2  ;;  %s1259_s6 = scalar_lea.sflag [#allocation4], %s1258_s12 }
 0x29c   : > { %p1557_p12 = pnand %p2226_p9, %p2225_p5 }
 0x29e   : > { %1889 = dma.done.wait (!%p1557_p12), %s1259_s6, 256  }
 0x29f   : > { %1891 = vsyncadd (!%p1557_p12), %s1259_s6, 4294967040  ;;  %p19_p1 = scmp.ge.s32.totalorder %s2061_s23, 4   ;;  %s2227_s18 = smov %s1898_s19 }
 0x2a0   : > { %s2228_s19 = smov %s1902_s20  ;;  %s2229_s20 = smov %s2070_s7 }
 0x2a1   : > { %s2230_s21 = smov %s2061_s23  ;;  %21 = sbr.rel (!%p19_p1) target bundleno = 6 (0x6), region = 93 }
 0x2a8   :  { %1264 = vsyncpa [#allocation3], 1 }
 0x2a9   :  { %1266 = vsyncpa [#allocation3 + $0x1], 1 }
 0x2aa   :  { %1267 = vsyncpa [#allocation6], 1 }
 0x2ab   :  { %1268 = vsyncpa [#allocation4], 1 }
 0x2ac   :  { %1270 = vsyncpa [#allocation4 + $0x1], 1 }

</bundles_post_ra>
